<compile_context>
chip_gen: v7x
topology: tpu7x:2x2x1
jax: 0.10.0
libtpu: 0.0.40
codegen_flags: <defaults>
</compile_context>

<pallas_src>
import jax
import jax.numpy as jnp
from jax import lax
from jax.experimental import pallas as pl
from jax.experimental.pallas import tpu as pltpu


def _bmm_permute_kernel(x1_ref, x2_ref, o_ref):
    # x1_ref: (Bt, M, K), x2_ref: (Bt, K, N), o_ref: (Bt, N, M)
    # out[b, n, m] = sum_k x2[b, k, n] * x1[b, m, k]  == (x1 @ x2).permute(0,2,1)
    res = lax.dot_general(
        x2_ref[...],
        x1_ref[...],
        dimension_numbers=(((1,), (2,)), ((0,), (0,))),
        preferred_element_type=jnp.float32,
    )  # (Bt, N, M)
    o_ref[...] = res.astype(o_ref.dtype)


# Past ~16 batches/step the ~0.35us per-grid-step overhead is already >95%
# amortized; larger Bt only blows up instruction count / vreg pressure.
_MAX_BATCH_TILE = 32


def bmm_permute(x1, x2, *, batch_tile=None, vmem_budget_bytes=24 * 1024 * 1024,
                force_pallas=False):
    """Equivalent of torch.bmm(x1, x2).permute(0, 2, 1).

    x1: (B, M, K), x2: (B, K, N)  ->  (B, N, M)
    """
    B, M, K = x1.shape
    B2, K2, N = x2.shape
    assert B == B2 and K == K2, "incompatible bmm shapes"

    itemsize = jnp.dtype(x1.dtype).itemsize

    # Below a small threshold the kernel is pure launch + masked-store overhead
    # (output minor dim < 128 => vst.msk, <1% MXU use). Let XLA fold the
    # permute into the bmm output layout instead, unless the caller insists.
    total_bytes = itemsize * B * (M * K + K * N + N * M)
    if total_bytes < (64 * 1024) and not force_pallas:
        return jnp.einsum("bmk,bkn->bnm", x1, x2)

    # --- pick batches per grid step -------------------------------------
    if batch_tile is None:
        # Pallas double-buffers inputs AND outputs.
        per_batch_bytes = 2 * itemsize * (M * K + K * N) + 2 * itemsize * (N * M)
        bt = max(1, vmem_budget_bytes // max(per_batch_bytes, 1))
        bt = min(bt, B, _MAX_BATCH_TILE)
        if B >= 2:
            # Keep >= 2 grid steps so the "parallel" batch axis can be sharded
            # across the two TensorCores of a v7x megacore.
            bt = min(bt, max(B // 2, 1))
        while B % bt:
            bt -= 1
        batch_tile = bt
    Bt = int(batch_tile)
    assert 1 <= Bt <= B and B % Bt == 0

    # Scoped-VMEM limit sized to the real double-buffered footprint + headroom;
    # stays well under every generation's physical VMEM (64 MiB on v7x).
    block_bytes = Bt * (2 * itemsize * (M * K + K * N) + 2 * itemsize * N * M)
    vmem_limit = int(min(max(block_bytes + (4 << 20), 8 << 20), 64 << 20))

    cost = pl.CostEstimate(
        flops=2 * B * M * N * K,
        bytes_accessed=itemsize * (B * M * K + B * K * N + B * N * M),
        transcendentals=0,
    )

    return pl.pallas_call(
        _bmm_permute_kernel,
        out_shape=jax.ShapeDtypeStruct((B, N, M), x1.dtype),
        grid_spec=pltpu.PrefetchScalarGridSpec(
            num_scalar_prefetch=0,
            grid=(B // Bt,),
            in_specs=[
                pl.BlockSpec((Bt, M, K), lambda b: (b, 0, 0)),
                pl.BlockSpec((Bt, K, N), lambda b: (b, 0, 0)),
            ],
            out_specs=pl.BlockSpec((Bt, N, M), lambda b: (b, 0, 0)),
        ),
        compiler_params=pltpu.CompilerParams(
            dimension_semantics=("parallel",),
            vmem_limit_bytes=vmem_limit,
        ),
        cost_estimate=cost,
    )(x1, x2)


def _ref(x1, x2):
    # Pure-JAX reference: torch.bmm(x1, x2).permute(0, 2, 1)
    return jnp.transpose(jnp.einsum("bmk,bkn->bmn", x1, x2), (0, 2, 1))


if __name__ == "__main__":
    key = jax.random.PRNGKey(0)
    k1, k2, k3, k4 = jax.random.split(key, 4)

    # --- Case A: exact module shapes (1, 2, 3) x (1, 3, 2) ----------------
    # Tiny -> wrapper dispatches to the XLA fast path (per review).
    a1 = jax.random.normal(k1, (1, 2, 3), dtype=jnp.float32)
    a2 = jax.random.normal(k2, (1, 3, 2), dtype=jnp.float32)
    out_a = jax.block_until_ready(bmm_permute(a1, a2))
    assert out_a.shape == (1, 2, 2)
    assert jnp.allclose(out_a, _ref(a1, a2), atol=1e-5, rtol=1e-5)

    # --- Case B: small batched problem through the Pallas kernel ----------
    B, M, K, N = 8, 8, 16, 8
    x1 = jax.random.normal(k3, (B, M, K), dtype=jnp.float32)
    x2 = jax.random.normal(k4, (B, K, N), dtype=jnp.float32)
    ref = _ref(x1, x2)

    # Auto batch_tile: caps at B//2 -> grid of >= 2 steps (v7x megacore).
    out_b = jax.block_until_ready(bmm_permute(x1, x2, force_pallas=True))
    assert out_b.shape == (B, N, M)
    assert jnp.allclose(out_b, ref, atol=1e-5, rtol=1e-5)

    # Explicit multi-step grid (exercises the batch-tiled pipeline).
    out_c = jax.block_until_ready(
        bmm_permute(x1, x2, batch_tile=2, force_pallas=True))
    assert jnp.allclose(out_c, ref, atol=1e-5, rtol=1e-5)

    print("KERNEL_OK")
</pallas_src>

<mosaic_0001>
module attributes {stable_mosaic.version = 11 : i64} {
  func.func @_bmm_permute_kernel(%arg0: i32, %arg1: memref<4x8x16xf32, #tpu.memory_space<vmem>>, %arg2: memref<4x16x8xf32, #tpu.memory_space<vmem>>, %arg3: memref<4x8x8xf32, #tpu.memory_space<vmem>>) attributes {dimension_semantics = [#tpu.dimension_semantics<parallel>], iteration_bounds = array<i64: 2>, scalar_prefetch = 0 : i64, scratch_operands = 0 : i64, tpu.core_type = #tpu.core_type<tc>, window_params = [{transform_indices = @transform_0, window_bounds = array<i64: 4, 8, 16>}, {transform_indices = @transform_1, window_bounds = array<i64: 4, 16, 8>}, {transform_indices = @transform_2, window_bounds = array<i64: 4, 8, 8>}]} {
    %c0 = arith.constant 0 : index
    %c0_0 = arith.constant 0 : index
    %c0_1 = arith.constant 0 : index
    %0 = vector.load %arg2[%c0, %c0_0, %c0_1] : memref<4x16x8xf32, #tpu.memory_space<vmem>>, vector<4x16x8xf32>
    %c0_2 = arith.constant 0 : index
    %c0_3 = arith.constant 0 : index
    %c0_4 = arith.constant 0 : index
    %1 = vector.load %arg1[%c0_2, %c0_3, %c0_4] : memref<4x8x16xf32, #tpu.memory_space<vmem>>, vector<4x8x16xf32>
    %cst = arith.constant dense<0.000000e+00> : vector<4x8x8xf32>
    %2 = tpu.matmul %0, %1, %cst {dimension_numbers = #tpu.dot_dimension_numbers<[1], [2], [2], [1], [0, 0, 0, 2, 1, 1], [0], [0]>} : vector<4x16x8xf32>, vector<4x8x16xf32>, vector<4x8x8xf32> -> vector<4x8x8xf32>
    %c0_5 = arith.constant 0 : index
    %c0_6 = arith.constant 0 : index
    %c0_7 = arith.constant 0 : index
    %3 = vector.load %arg3[%c0_5, %c0_6, %c0_7] : memref<4x8x8xf32, #tpu.memory_space<vmem>>, vector<4x8x8xf32>
    tpu.vector_store %arg3[%c0_5, %c0_6, %c0_7], %2 {strides = array<i32>} : memref<4x8x8xf32, #tpu.memory_space<vmem>>, vector<4x8x8xf32>,
    return
  }
  func.func @transform_0(%arg0: i32) -> (i32, i32, i32) {
    %c0_i32 = arith.constant 0 : i32
    %c0_i32_0 = arith.constant 0 : i32
    %c0_i32_1 = arith.constant 0 : i32
    return %arg0, %c0_i32, %c0_i32_0 : i32, i32, i32
  }
  func.func @transform_1(%arg0: i32) -> (i32, i32, i32) {
    %c0_i32 = arith.constant 0 : i32
    %c0_i32_0 = arith.constant 0 : i32
    %c0_i32_1 = arith.constant 0 : i32
    return %arg0, %c0_i32, %c0_i32_0 : i32, i32, i32
  }
  func.func @transform_2(%arg0: i32) -> (i32, i32, i32) {
    %c0_i32 = arith.constant 0 : i32
    %c0_i32_0 = arith.constant 0 : i32
    %c0_i32_1 = arith.constant 0 : i32
    return %arg0, %c0_i32, %c0_i32_0 : i32, i32, i32
  }
}

</mosaic_0001>

<bundles_post_ra>
// kernel: tpu_custom_call.1
= control target key start
LH: loop header
LB: loop body
LE: loop exit
PB: predicated region body
PF: predicated region fallthrough
CT: control target
= control target key end

     0   :  { %7 = vsyncpa [#allocation3], 0  ;;  %s1005_s0 = inlined_call_operand.vmem [shape: f32[8,8,16], index: 0, kind: input, shape index: {}]   ;;  %s1006_s1 = inlined_call_operand.vmem [shape: f32[8,16,8], index: 1, kind: input, shape index: {}]   ;;  %s1007_s2 = inlined_call_operand.hbm [shape: f32[8,8,8], index: 2, kind: output, shape index: {}]  }
   0x1   :  { %9 = vsyncpa [#allocation3 + $0x1], 0  ;;  %s888_s9 = smov 0   ;;  %s890_s10 = smov 0  }
   0x2   :  { %s892_s11 = smov 0   ;;  %s894_s12 = smov 0  }
   0x3 LB: > { %s909_s13 = sadd.s32 4294967295, %s866_s12   ;;  %s708_s14 = sadd.s32 4294967294, %s866_s12   ;;  %s866_s12 = sphi %s894_s12, %s1013_s12   ;;  %s862_s11 = sphi %s892_s11, %s1012_s11   ;;  %s858_s10 = sphi %s890_s10, %s1011_s10   ;;  %s854_s9 = sphi %s888_s9, %s1010_s9  }
   0x4   : > { %s913_s15 = sadd.s32 1, %s866_s12   ;;  %s74_s16 = sadd.s32 1, %s862_s11 }
   0x5   : > { %s71_s17 = ssub.s32 %s866_s12, %s913_s15  ;;  %p84_p0 = scmp.ne.s32.totalorder %s862_s11, %s858_s10 }
   0x6   : > { %p72_p1 = scmp.eq.s32.totalorder %s71_s17, 0  ;;  %p85_p2 = scmp.eq.s32.totalorder %s909_s13, 1 }
   0x7   : > { %p90_p3 = scmp.ne.s32.totalorder %s858_s10, %s854_s9  ;;  %p91_p4 = scmp.eq.s32.totalorder %s708_s14, 1 }
   0x8   : > { %s924_s18 = scalar_select %p72_p1, %s862_s11, %s74_s16  }
   0x9   : > { %p926_p5 = por %p85_p2, %p84_p0  ;;  %p930_p6 = por %p91_p4, %p90_p3 }
   0xa   : > { %p711_p7 = scmp.ge.s32.totalorder %s866_s12, 1  ;;  %p128_p8 = scmp.lt.s32.totalorder %s866_s12, 3 }
   0xc   : > { %p129_p9 = pnand %p711_p7, %p128_p8 }
   0xd   : > { %s713_s21 = sshll.u32 (!%p129_p9), %s909_s13, 2  ;;  %v868_v0 = vmov (!%p129_p9), 0.0   ;;  %vm869_vm0 = vmmov (!%p129_p9), 0   ;;  %vm214_vm1 = vcmask (!%p129_p9), 130048   ;;  %s153_s30 = sand.u32 (!%p129_p9), 1, %s858_s10   ;;  %vm615_vm2 = vcmask (!%p129_p9), 64512  }
   0xe   : > { %132 = sbr.rel (%p129_p9) target bundleno = 389 (0x185), region = 28  ;;  %p157_p10 = scmp.lt.s32.totalorder (!%p129_p9), %s713_s21, 7  ;;  %741 = vmatprep.subr.mxu0 (!%p129_p9), %v868_v0  ;;  %746 = vmatprep.subr.mxu1 (!%p129_p9), %v868_v0 }
   0xf   : > { %743 = vmatprep.mubr.msk.f32.mxu0 (!%p129_p9), %vm869_vm0, %v868_v0  ;;  %748 = vmatprep.mubr.msk.f32.mxu1 (!%p129_p9), %vm869_vm0, %v868_v0  ;;  %s712_s3 = sshll.u32 (!%p129_p9), %s153_s30, 5  ;;  %s732_s6 = sshll.u32 (!%p129_p9), %s909_s13, 9 }
  0x10   : > { %s155_s4 = scalar_lea.vmem (!%p129_p9), [#allocation2], %s712_s3  ;;  %s962_s14 = scalar_lea.hbm (!%p129_p9), %s1007_s2, %s732_s6 }
  0x11   : > { %s634_s5 = sshll.u32 (!%p129_p9), %s155_s4, 4  ;;  %s964_s16 = scalar_lea.sflag (!%p129_p9), [#allocation3], %s153_s30  ;;  %s957_s5 = int_to_ptr.vmem [resolvable:$true] %s634_s5 }
  0x12   : > { %s804_s17 = scalar_lea.vmem (!%p129_p9), %s957_s5, 512  ;;  %s870_s13 = smov (!%p129_p9), [#allocation2]  }
  0x13   : > { %p805_p11 = scmp.ne.s32.totalorder (!%p129_p9), %s957_s5, %s804_s17 }
  0x15   : > { %s1015_s21 = smov (!%p157_p10, %s713_s21), 7  ;;  %p806_p12 = pnand %p805_p11, %p926_p5 }
  0x16   : > { %s731_s22 = sshll.u32 %s1015_s21, 4  ;;  %s714_s23 = sshll.u32 %s1015_s21, 3 }
  0x17   : > { %s167_s26 = scalar_lea.vmem %s1006_s1, %s731_s22  ;;  %s160_s29 = scalar_lea.vmem %s1005_s0, %s714_s23 }
  0x18   : > { %v172_v1 = vld [vmem:[%s167_s26 + $0x10] sm:$0xff]  ;;  %v170_v2 = vld [vmem:[%s167_s26] sm:$0xff]  ;;  %v173_v3 = vld [vmem:[%s167_s26 + $0x18] sm:$0xff]  ;;  %p807_p13 = pneg %p806_p12  ;;  %s808_s21 = sshll.u32 %s870_s13, 4  ;;  %s809_s21 = int_to_ptr.vmem [resolvable:$false] %s808_s21 }
  0x19   : > { %291 = vxpose.xlu1.b32.start [1/2] (short) (narrow) %v172_v1, 8  ;;  %182 = vxpose.xlu0.b32.start [1/2] (short) (narrow) %v170_v2, 8  ;;  %v171_v4 = vld [vmem:[%s167_s26 + $0x8] sm:$0xff]  ;;  %v178_v5 = vld [vmem:[%s160_s29] sm:$0xff]  ;;  %v176_v7 = vld [vmem:[%s167_s26 + $0x30] sm:$0xff]  ;;  %s810_s22 = scalar_lea.vmem %s809_s21, 1024  ;;  %p811_p0 = scmp.lt.s32.totalorder %s957_s5, %s809_s21 }
  0x1a   : > { %742 = vmatpush3.xpose.msk.msra.mxu0 %vm214_vm1, %v178_v5  ;;  %v179_v6 = vld [vmem:[%s160_s29 + $0x8] sm:$0xff]  ;;  %v174_v8 = vld [vmem:[%s167_s26 + $0x20] sm:$0xff]  ;;  %v177_v9 = vld [vmem:[%s167_s26 + $0x38] sm:$0xff]  ;;  %p812_p1 = scmp.lt.s32.totalorder %s810_s22, %s804_s17 }
  0x1b   : > { %747 = vmatpush3.xpose.msk.msra.mxu1 %vm214_vm1, %v179_v6  ;;  %751 = vmatprep.subr.mxu0 %v868_v0  ;;  %v175_v10 = vld [vmem:[%s167_s26 + $0x28] sm:$0xff]  ;;  %v180_v11 = vld [vmem:[%s160_s29 + $0x10] sm:$0xff]  ;;  %v181_v12 = vld [vmem:[%s160_s29 + $0x18] sm:$0xff] }
  0x1c   : > { %756 = vmatprep.subr.mxu1 %v868_v0  ;;  %p813_p2 = por %p812_p1, %p811_p0 }
  0x1d   : > { %292 = vxpose.xlu1.b32.end [2/2] (short) (narrow) %v173_v3, 8  ;;  %183 = vxpose.xlu0.b32.end [2/2] (short) (narrow) %v171_v4, 8 }
  0x1e   : > { %p814_p3 = pnand %p813_p2, %p807_p13 }
  0x21   : > { %507 = vxpose.xlu1.b32.start [1/2] (short) (narrow) %v176_v7, 8  ;;  %399 = vxpose.xlu0.b32.start [1/2] (short) (narrow) %v174_v8, 8 }
  0x25   : > { %508 = vxpose.xlu1.b32.end [2/2] (short) (narrow) %v177_v9, 8  ;;  %400 = vxpose.xlu0.b32.end [2/2] (short) (narrow) %v175_v10, 8 }
  0x99   : > { %v307_v13 = vpop.trf.xlu1  ;;  %v198_v14 = vpop.trf.xlu0 }
  0x9a   : > { %744 = vmatmul.mubr.msk.f32.vlgmr.msra.gmra.mrb[0].mxu0 %vm214_vm1, %v198_v14  ;;  %749 = vmatmul.mubr.msk.f32.vlgmr.msra.gmra.mrb[0].mxu1 %vm214_vm1, %v307_v13 }
  0x9b   : > { %752 = vmatpush3.xpose.msk.msra.mxu0 %vm214_vm1, %v180_v11  ;;  %757 = vmatpush3.xpose.msk.msra.mxu1 %vm214_vm1, %v181_v12 }
  0x9c   : > { %753 = vmatprep.mubr.msk.f32.mxu0 %vm869_vm0, %v868_v0  ;;  %758 = vmatprep.mubr.msk.f32.mxu1 %vm869_vm0, %v868_v0 }
  0xa1   : > { %v523_v15 = vpop.trf.xlu1  ;;  %v415_v16 = vpop.trf.xlu0 }
  0xa2   : > { %754 = vmatmul.mubr.msk.f32.vlgmr.msra.gmra.mrb[2].mxu0 %vm214_vm1, %v415_v16  ;;  %759 = vmatmul.mubr.msk.f32.vlgmr.msra.gmra.mrb[2].mxu1 %vm214_vm1, %v523_v15 }
 0x16d   : > { %v287_v17 = vpop.f32.mrb[0].mxu0  ;;  %v395_v18 = vpop.f32.mrb[0].mxu1 }
 0x16e   : > { %616 = vst.msk [vmem:[%s155_s4] sm:$0xff] %vm615_vm2, %v287_v17  ;;  %617 = vst.msk [vmem:[%s155_s4 + $0x8] sm:$0xff] %vm615_vm2, %v395_v18  ;;  %v745_v19 = vpop.f32.mrb[1].mxu0  ;;  %v750_v20 = vpop.f32.mrb[1].mxu1 }
 0x175   : > { %v503_v21 = vpop.f32.mrb[2].mxu0  ;;  %v611_v22 = vpop.f32.mrb[2].mxu1 }
 0x176   : > { %618 = vst.msk [vmem:[%s155_s4 + $0x10] sm:$0xff] %vm615_vm2, %v503_v21  ;;  %619 = vst.msk [vmem:[%s155_s4 + $0x18] sm:$0xff] %vm615_vm2, %v611_v22  ;;  %v755_v23 = vpop.f32.mrb[3].mxu0  ;;  %v760_v24 = vpop.f32.mrb[3].mxu1 }
 0x177   : > { %817 = shalt.err (!%p814_p3)
}
 0x178   : > { %s818_s23 = scalar_lea.hbm %s962_s14, 512  ;;  %s822_s26 = scalar_lea.hbm %s1007_s2, 1024 }
 0x179   : > { %p819_p4 = scmp.ne.s32.totalorder %s962_s14, %s818_s23  ;;  %p823_p9 = scmp.lt.u32.totalorder %s962_s14, %s1007_s2 }
 0x17a   : > { %p824_p10 = scmp.lt.u32.totalorder %s822_s26, %s818_s23  ;;  %p826_p12 = scmp.lt.u32.totalorder %s818_s23, %s962_s14 }
 0x17b   : > { %p820_p7 = pnand %p819_p4, %p926_p5 }
 0x17c   : > { %p825_p11 = por %p824_p10, %p823_p9 }
 0x17d   : > { %p821_p8 = pneg %p820_p7 }
 0x17e   : > { %p827_p13 = por %p826_p12, %p825_p11 }
 0x180   : > { %p828_p0 = pnand %p827_p13, %p821_p8 }
 0x182   : > { %831 = shalt.err (!%p828_p0)
}
 0x183   : > { %s871_s29 = smov 128   ;;  %s872_s30 = smov 8  }
 0x184   : > { %761 = dma.vmem_to_hbm [thread:$0]  (%p926_p5), %s957_s5, 512, %s962_s14, %s964_s16, %s871_s29, %s871_s29, %s872_s30  }
 0x185 PF: > { %p767_p1 = scmp.ge.s32.totalorder %s866_s12, 2  ;;  %s649_s3 = sand.u32 1, %s854_s9  }
 0x186   : > { %s650_s4 = scalar_lea.sflag [#allocation3], %s649_s3 }
 0x187   : > { %p764_p2 = pnand %p767_p1, %p930_p6 }
 0x189   : > { %849 = dma.done.wait (!%p764_p2), %s650_s4, 512  }
 0x18a   : > { %851 = vsyncadd (!%p764_p2), %s650_s4, 4294966784  ;;  %p12_p3 = scmp.ge.s32.totalorder %s913_s15, 4   ;;  %s1010_s9 = smov %s858_s10 }
 0x18b   : > { %s1011_s10 = smov %s862_s11  ;;  %s1012_s11 = smov %s924_s18 }
 0x18c   : > { %s1013_s12 = smov %s913_s15  ;;  %14 = sbr.rel (!%p12_p3) target bundleno = 3 (0x3), region = 66 }
 0x193   :  { %655 = vsyncpa [#allocation3], 1 }
 0x194   :  { %657 = vsyncpa [#allocation3 + $0x1], 1 }

</bundles_post_ra>
